<compile_context>
chip_gen: v7x
topology: tpu7x:2x2x1
jax: 0.10.0
libtpu: 0.0.40
codegen_flags: <defaults>
</compile_context>

<pallas_src>
import jax
import jax.numpy as jnp
import numpy as np
from jax.experimental import pallas as pl
from jax.experimental.pallas import tpu as pltpu

# --- problem sizes (small, consistent with the module's __init__) -----------
N_FACTS = 4                                        # number of probabilistic facts
N_ACTIONS = 4                                      # size of the 'action' AD
N_ADS = 1                                          # single annotated disjunction
N_WORLDS = (2 ** N_FACTS) * (N_ACTIONS ** N_ADS)   # 64
EPS = 1e-9
N_LANES = 128                                      # lane-dense output width

# query_struct: 'safe_action' is a dict of N_ACTIONS entries, 'safe_next' is scalar
QUERY_STRUCT = {"safe_action": {i: i for i in range(N_ACTIONS)}, "safe_next": 0}
N_QUERIES = N_ACTIONS + 1

INPUT_STRUCT_KEYS = ("facts", "action")            # order used by dict_to_worlds


# --- deterministic parameter construction (mirrors _init), all host-side -----
def build_parameters():
    # w_facts: binary enumeration of fact worlds (MSB first), then
    # repeat_interleave by n_actions ** n_ads along dim 0.
    idx = np.arange(2 ** N_FACTS)
    bits = ((idx[:, None] >> np.arange(N_FACTS - 1, -1, -1)) & 1).astype(np.float32)
    w_facts = np.repeat(bits, N_ACTIONS ** N_ADS, axis=0)                 # (N_WORLDS, N_FACTS)

    # n_ads == 1 branch: eye(n_actions) tiled 2**n_facts times.
    w_actions = np.tile(np.eye(N_ACTIONS, dtype=np.float32),
                        (2 ** N_FACTS, 1))                                # (N_WORLDS, N_ACTIONS)

    # TODO(synk): in the reference, w_queries comes from compiling the ProbLog
    # program to a DDNNF and evaluating every world (NaN worlds dropped); here
    # we substitute deterministic synthetic per-world 0/1 query truth values
    # since no ProbLog engine is available.
    rng = np.random.default_rng(1234)
    w_queries = (rng.random((N_WORLDS, N_QUERIES)) > 0.5).astype(np.float32)

    # Kernel constants, precomputed once:
    #   W_stacked rows: [W_f.T ; W_a.T ; (1-W_f).T]  -> matches xin column order
    w_stacked = np.concatenate(
        [w_facts.T, w_actions.T, (1.0 - w_facts).T], axis=0).astype(np.float32)   # (12, 64)
    # Lane-dense query matrix: zero-pad to 128 output lanes.
    w_q_pad = np.zeros((N_WORLDS, N_LANES), dtype=np.float32)
    w_q_pad[:, :N_QUERIES] = w_queries                                             # (64, 128)

    return (jnp.asarray(w_facts), jnp.asarray(w_actions), jnp.asarray(w_queries),
            jnp.asarray(w_stacked), jnp.asarray(w_q_pad))


# --- Pallas kernel: single log pass + two MXU matmuls -------------------------
def dpl_kernel(xin_ref, w_ref, wq_ref, out_ref):
    # xin columns: [p_facts (4), p_ads (4), 1 - p_facts (4)]
    logs = jnp.log(xin_ref[...] + EPS)                                   # (B_pad, 12)
    lp_w = jnp.dot(logs, w_ref[...],
                   preferred_element_type=jnp.float32)                   # (B_pad, N_WORLDS)
    p_w = jnp.exp(lp_w)
    out_ref[...] = jnp.dot(p_w, wq_ref[...],
                           preferred_element_type=jnp.float32)           # (B_pad, 128)


# --- wrapper: dict glue + pallas_call -----------------------------------------
def deepproblog_forward(x, w_stacked, w_q_pad):
    # dict_to_worlds
    xx = jnp.concatenate([x[k] for k in INPUT_STRUCT_KEYS], axis=1).astype(jnp.float32)
    B = xx.shape[0]

    # Single activation slab fed to the kernel: [p_facts, p_ads, 1 - p_facts].
    xin = jnp.concatenate([xx, 1.0 - xx[:, :N_FACTS]], axis=1)           # (B, 12)

    # Pad batch to a multiple of 8 sublanes (zeros are harmless: log(eps) is finite).
    B_pad = max(8, ((B + 7) // 8) * 8)
    if B_pad != B:
        xin = jnp.pad(xin, ((0, B_pad - B), (0, 0)))

    p_pad = pl.pallas_call(
        dpl_kernel,
        out_shape=jax.ShapeDtypeStruct((B_pad, N_LANES), jnp.float32),
        in_specs=[pl.BlockSpec(memory_space=pltpu.MemorySpace.VMEM)] * 3,
        out_specs=pl.BlockSpec(memory_space=pltpu.MemorySpace.VMEM),
    )(xin, w_stacked, w_q_pad)

    p_queries = p_pad[:B, :N_QUERIES]

    # tensor_to_dict
    results = {}
    count = 0
    for k, v in QUERY_STRUCT.items():
        if isinstance(v, dict):
            results[k] = p_queries[:, count:count + len(v)]
            count += len(v)
        else:
            results[k] = p_queries[:, count:count + 1]
            count += 1
    return results


def reference_forward(x, w_facts, w_actions, w_queries):
    xx = jnp.concatenate([x[k] for k in INPUT_STRUCT_KEYS], axis=1).astype(jnp.float32)
    p_facts, p_ads = xx[:, :N_FACTS], xx[:, N_FACTS:]
    lp_w = (jnp.log(p_facts + EPS) @ w_facts.T
            + jnp.log(1 - p_facts + EPS) @ (1 - w_facts.T)
            + jnp.log(p_ads + EPS) @ w_actions.T)
    return jnp.exp(lp_w) @ w_queries


if __name__ == "__main__":
    B = 2
    key = jax.random.PRNGKey(0)
    kf, ka = jax.random.split(key)

    # fact probabilities in (0,1); action probabilities = softmax (sum to 1)
    x = {
        "facts": jax.nn.sigmoid(jax.random.normal(kf, (B, N_FACTS))),
        "action": jax.nn.softmax(jax.random.normal(ka, (B, N_ACTIONS)), axis=-1),
    }

    w_facts, w_actions, w_queries, w_stacked, w_q_pad = build_parameters()

    out = deepproblog_forward(x, w_stacked, w_q_pad)
    jax.block_until_ready(out)

    # sanity check against a pure-JAX reference (un-fused formulation)
    ref = reference_forward(x, w_facts, w_actions, w_queries)
    got = jnp.concatenate([out["safe_action"], out["safe_next"]], axis=1)
    np.testing.assert_allclose(np.asarray(got), np.asarray(ref), rtol=1e-4, atol=1e-5)

    print("KERNEL_OK")
</pallas_src>

<mosaic_0001>
module attributes {stable_mosaic.version = 11 : i64} {
  func.func @dpl_kernel(%arg0: memref<8x12xf32, #tpu.memory_space<vmem>>, %arg1: memref<12x64xf32, #tpu.memory_space<vmem>>, %arg2: memref<64x128xf32, #tpu.memory_space<vmem>>, %arg3: memref<8x128xf32, #tpu.memory_space<vmem>>) attributes {dimension_semantics = [], scalar_prefetch = 0 : i64, scratch_operands = 0 : i64, tpu.core_type = #tpu.core_type<tc>} {
    %c0 = arith.constant 0 : index
    %c0_0 = arith.constant 0 : index
    %0 = vector.load %arg0[%c0, %c0_0] : memref<8x12xf32, #tpu.memory_space<vmem>>, vector<8x12xf32>
    %cst = arith.constant 9.99999971E-10 : f32
    %1 = vector.broadcast %cst : f32 to vector<8x12xf32>
    %2 = arith.addf %0, %1 : vector<8x12xf32>
    %3 = math.log %2 : vector<8x12xf32>
    %c0_1 = arith.constant 0 : index
    %c0_2 = arith.constant 0 : index
    %4 = vector.load %arg1[%c0_1, %c0_2] : memref<12x64xf32, #tpu.memory_space<vmem>>, vector<12x64xf32>
    %cst_3 = arith.constant dense<0.000000e+00> : vector<8x64xf32>
    %5 = tpu.matmul %3, %4, %cst_3 {dimension_numbers = #tpu.dot_dimension_numbers<[1], [0], [0], [1], [0, 0, 1, 1], [], []>} : vector<8x12xf32>, vector<12x64xf32>, vector<8x64xf32> -> vector<8x64xf32>
    %6 = math.exp %5 : vector<8x64xf32>
    %c0_4 = arith.constant 0 : index
    %c0_5 = arith.constant 0 : index
    %7 = vector.load %arg2[%c0_4, %c0_5] : memref<64x128xf32, #tpu.memory_space<vmem>>, vector<64x128xf32>
    %cst_6 = arith.constant dense<0.000000e+00> : vector<8x128xf32>
    %8 = tpu.matmul %6, %7, %cst_6 {dimension_numbers = #tpu.dot_dimension_numbers<[1], [0], [0], [1], [0, 0, 1, 1], [], []>} : vector<8x64xf32>, vector<64x128xf32>, vector<8x128xf32> -> vector<8x128xf32>
    %c0_7 = arith.constant 0 : index
    %c0_8 = arith.constant 0 : index
    %9 = vector.load %arg3[%c0_7, %c0_8] : memref<8x128xf32, #tpu.memory_space<vmem>>, vector<8x128xf32>
    tpu.vector_store %arg3[%c0_7, %c0_8], %8 {strides = array<i32>} : memref<8x128xf32, #tpu.memory_space<vmem>>, vector<8x128xf32>,
    return
  }
}

</mosaic_0001>

<bundles_post_ra>
// kernel: tpu_custom_call.1
= control target key start
LH: loop header
LB: loop body
LE: loop exit
PB: predicated region body
PF: predicated region fallthrough
CT: control target
= control target key end

     0   :  { %8 = vsyncpa [#allocation3], 0  ;;  %s488_s0 = inlined_call_operand.hbm [shape: f32[8,12], index: 0, kind: input, shape index: {}]   ;;  %s489_s1 = inlined_call_operand.hbm [shape: f32[12,64], index: 1, kind: input, shape index: {}]   ;;  %s490_s2 = inlined_call_operand.hbm [shape: f32[64,128], index: 2, kind: input, shape index: {}]   ;;  %s491_s3 = inlined_call_operand.hbm [shape: f32[8,128], index: 3, kind: output, shape index: {}]  }
   0x1   :  { %9 = vsyncpa [#allocation6], 0 }
   0x2   :  { %10 = vsyncpa [#allocation4], 0  ;;  %s404_s12 = smov [#allocation5]   ;;  %s310_s16 = scalar_lea.hbm %s489_s1, 256 }
   0x3   :  { %s26_s13 = sshll.u32 %s404_s12, 4  ;;  %p311_p0 = scmp.ne.s32.totalorder %s489_s1, %s310_s16  ;;  %s27_s13 = int_to_ptr.vmem [resolvable:$true] %s26_s13 }
   0x4   :  { %p314_p1 = scmp.lt.u32.totalorder %s310_s16, %s489_s1 }
   0x6   :  { %p316_p2 = pnand %p314_p1, %p311_p0 }
   0x8   :  { %319 = shalt.err (!%p316_p2)
}
   0x9   :  { %s320_s21 = scalar_lea.vmem %s27_s13, 256  ;;  %p325_p4 = scmp.lt.s32.totalorder %s27_s13, %s27_s13 }
   0xa   :  { %p321_p3 = scmp.ne.s32.totalorder %s27_s13, %s320_s21  ;;  %p326_p5 = scmp.lt.s32.totalorder %s320_s21, %s320_s21 }
   0xc   :  { %p327_p6 = por %p326_p5, %p325_p4 }
   0xe   :  { %p328_p7 = pnand %p327_p6, %p321_p3 }
  0x10   :  { %331 = shalt.err (!%p328_p7)
}
  0x11   :  { %s405_s22 = smov 128   ;;  %s406_s23 = smov 8  }
  0x12   :  { %32 = dma.hbm_to_vmem [thread:$0]  %s489_s1, 256, %s27_s13, [#allocation6], %s405_s22, %s405_s22, %s406_s23  }
  0x13   :  { %s407_s26 = smov [#allocation2]   ;;  %s408_s28 = smov [#allocation7]  }
  0x14   :  { %s17_s27 = sshll.u32 %s407_s26, 4  ;;  %s38_s29 = sshll.u32 %s408_s28, 4  ;;  %s18_s27 = int_to_ptr.vmem [resolvable:$true] %s17_s27  ;;  %s39_s29 = int_to_ptr.vmem [resolvable:$true] %s38_s29 }
  0x15   :  { %s332_s5 = scalar_lea.hbm %s488_s0, 128 }
  0x16   :  { %p333_p8 = scmp.ne.s32.totalorder %s488_s0, %s332_s5  ;;  %p336_p9 = scmp.lt.u32.totalorder %s332_s5, %s488_s0 }
  0x18   :  { %p338_p10 = pnand %p336_p9, %p333_p8 }
  0x1a   :  { %341 = shalt.err (!%p338_p10)
}
  0x1b   :  { %s342_s1 = scalar_lea.vmem %s18_s27, 128  ;;  %p347_p12 = scmp.lt.s32.totalorder %s18_s27, %s18_s27 }
  0x1c   :  { %p343_p11 = scmp.ne.s32.totalorder %s18_s27, %s342_s1  ;;  %p348_p13 = scmp.lt.s32.totalorder %s342_s1, %s342_s1 }
  0x1e   :  { %p349_p0 = por %p348_p13, %p347_p12 }
  0x20   :  { %p350_p1 = pnand %p349_p0, %p343_p11 }
  0x22   :  { %353 = shalt.err (!%p350_p1)
}
  0x23   :  { %20 = dma.hbm_to_vmem [thread:$0]  %s488_s0, 128, %s18_s27, [#allocation3]  }
  0x24   :  { %s354_s14 = scalar_lea.hbm %s490_s2, 1024 }
  0x25   :  { %p355_p2 = scmp.ne.s32.totalorder %s490_s2, %s354_s14  ;;  %p358_p3 = scmp.lt.u32.totalorder %s354_s14, %s490_s2 }
  0x27   :  { %p360_p4 = pnand %p358_p3, %p355_p2 }
  0x29   :  { %363 = shalt.err (!%p360_p4)
}
  0x2a   :  { %s364_s19 = scalar_lea.vmem %s39_s29, 1024  ;;  %p369_p6 = scmp.lt.s32.totalorder %s39_s29, %s39_s29 }
  0x2b   :  { %p365_p5 = scmp.ne.s32.totalorder %s39_s29, %s364_s19  ;;  %p370_p7 = scmp.lt.s32.totalorder %s364_s19, %s364_s19 }
  0x2d   :  { %p371_p8 = por %p370_p7, %p369_p6 }
  0x2f   :  { %p372_p9 = pnand %p371_p8, %p365_p5 }
  0x31   :  { %375 = shalt.err (!%p372_p9)
}
  0x32   :  { %44 = dma.hbm_to_vmem [thread:$0]  %s490_s2, 1024, %s39_s29, [#allocation6], %s405_s22, %s405_s22, %s406_s23  }
  0x33   :  { %398 = dma.done.wait [#allocation3], 128  }
  0x34   :  { %399 = vsyncadd [#allocation3], 4294967168 }
  0x35   :  { %400 = dma.done.wait [#allocation6], 1280  }
  0x36   :  { %401 = vsyncadd [#allocation6], 4294966016  ;;  %v409_v0 = vmov 0.0|0.0   ;;  %vm410_vm0 = vmmov 0   ;;  %v411_v1 = vmov 0.0   ;;  %vm64_vm1 = vcmask 1043456  }
  0x37   :  { %280 = vmatprep.subr.bf16.mxu0 %v409_v0  ;;  %284 = vmatprep.subr.bf16.mxu1 %v409_v0  ;;  %vm412_vm2 = vmmov 1   ;;  %v58_v2 = vld [vmem:[#allocation5] sm:$0xff]  ;;  %v59_v3 = vld [vmem:[#allocation5 + $0x8] sm:$0xf]  ;;  %v54_v4 = vld [vmem:[#allocation2] sm:$0xff]  ;;  %vm60_vm4 = vcmask 97280  }
  0x38   :  { %258 = vmatprep.mubr.msk.f32.mxu0 %vm410_vm0, %v411_v1  ;;  %277 = vmatprep.mubr.msk.f32.mxu1 %vm410_vm0, %v411_v1  ;;  %vm282_vm3 = vmpackc.low %vm64_vm1, %vm412_vm2  ;;  %v281_v5 = vpack.c.bf16 %v59_v3, %v58_v2  ;;  %v55_v6 = vadd.f32 1e-09, %v54_v4  ;;  %v140_v7 = vld [vmem:[#allocation7] sm:$0xff]  ;;  %v141_v8 = vld [vmem:[#allocation7 + $0x8] sm:$0xff]  ;;  %vm148_vm5 = vcmask 523264   ;;  %s413_s2 = smov [#allocation8]  }
  0x39   :  { %v285_v9 = vpack.c.bf16 %v141_v8, %v140_v7  ;;  %v142_v12 = vld [vmem:[#allocation7 + $0x10] sm:$0xff]  ;;  %v143_v13 = vld [vmem:[#allocation7 + $0x18] sm:$0xff]  ;;  %v144_v15 = vld [vmem:[#allocation7 + $0x20] sm:$0xff]  ;;  %s229_s21 = sshll.u32 %s413_s2, 4  ;;  %s230_s21 = int_to_ptr.vmem [resolvable:$true] %s229_s21 }
  0x3a   :  { %283 = vmatpush3.bf16.msk.msra.mxu0 %vm282_vm3, %v281_v5  ;;  %306 = vlog2.f32 %v55_v6  ;;  %v288_v14 = vpack.c.bf16 %v143_v13, %v142_v12  ;;  %v145_v16 = vld [vmem:[#allocation7 + $0x28] sm:$0xff]  ;;  %v146_v18 = vld [vmem:[#allocation7 + $0x30] sm:$0xff]  ;;  %v147_v19 = vld [vmem:[#allocation7 + $0x38] sm:$0xff]  ;;  %s376_s22 = scalar_lea.vmem %s230_s21, 128  ;;  %p381_p11 = scmp.lt.s32.totalorder %s230_s21, %s230_s21 }
  0x3b   :  { %286 = vmatpush3.bf16.msra.mxu1 %v285_v9  ;;  %v291_v17 = vpack.c.bf16 %v145_v16, %v144_v15  ;;  %v294_v20 = vpack.c.bf16 %v147_v19, %v146_v18  ;;  %p377_p10 = scmp.ne.s32.totalorder %s230_s21, %s376_s22  ;;  %p382_p12 = scmp.lt.s32.totalorder %s376_s22, %s376_s22 }
  0x3c   :  { %287 = vmatprep.subr.bf16.mxu1 %v409_v0 }
  0x3d   :  { %p383_p13 = por %p382_p12, %p381_p11 }
  0x3f   :  { %289 = vmatpush3.bf16.msra.mxu1 %v288_v14  ;;  %p384_p0 = pnand %p383_p13, %p377_p10 }
  0x40   :  { %290 = vmatprep.subr.bf16.mxu1 %v409_v0 }
  0x43   :  { %292 = vmatpush3.bf16.msra.mxu1 %v291_v17 }
  0x44   :  { %v307_v10 = vpop.eup %306  ;;  %293 = vmatprep.subr.bf16.mxu1 %v409_v0 }
  0x45   :  { %v57_v11 = vmul.f32 0.6931472, %v307_v10 }
  0x47   :  { %259 = vmatmul.mubr.msk.f32.vlgmr.msra.gmra.mrb[0].mxu0 %vm60_vm4, %v57_v11  ;;  %295 = vmatpush3.bf16.msra.mxu1 %v294_v20 }
 0x11a   :  { %v134_v21 = vpop.f32.mrb[0].mxu0 }
 0x11b   :  { %v138_v22 = vmul.f32 1.442695, %v134_v21  ;;  %v260_v23 = vpop.f32.mrb[1].mxu0 }
 0x11d   :  { %308 = vpow2.f32 %v138_v22 }
 0x127   :  { %v309_v24 = vpop.eup %308 }
 0x128   :  { %278 = vmatmul.mubr.msk.f32.vlgmr.msra.gmra.mrb[0].mxu1 %vm148_vm5, %v309_v24 }
 0x1fb   :  { %v218_v25 = vpop.f32.mrb[0].mxu1 }
 0x1fc   :  { %222 = vst [vmem:[#allocation8] sm:$0xff] %v218_v25  ;;  %v279_v26 = vpop.f32.mrb[1].mxu1 }
 0x1fd   :  { %387 = shalt.err (!%p384_p0)
}
 0x1fe   :  { %s388_s25 = scalar_lea.hbm %s491_s3, 128 }
 0x1ff   :  { %p389_p1 = scmp.ne.s32.totalorder %s491_s3, %s388_s25  ;;  %p392_p2 = scmp.lt.u32.totalorder %s388_s25, %s491_s3 }
 0x201   :  { %p394_p3 = pnand %p392_p2, %p389_p1 }
 0x203   :  { %397 = shalt.err (!%p394_p3)
}
 0x204   :  { %232 = dma.vmem_to_hbm [thread:$0]  %s230_s21, 128, %s491_s3, [#allocation4]  }
 0x205   :  { %402 = dma.done.wait [#allocation4], 128  }
 0x206   :  { %403 = vsyncadd [#allocation4], 4294967168 }
 0x207   :  { %236 = vsyncpa [#allocation3], 1 }
 0x208   :  { %237 = vsyncpa [#allocation6], 1 }
 0x209   :  { %238 = vsyncpa [#allocation4], 1 }

</bundles_post_ra>
